<compile_context>
chip_gen: v6e
topology: v6e:2x2x1
jax: 0.10.0
libtpu: 0.0.40
codegen_flags: <defaults>
</compile_context>

<pallas_src>
import jax
import jax.numpy as jnp
from jax import lax
from jax.experimental import pallas as pl
from jax.experimental.pallas import tpu as pltpu


def decoder_embeddings_kernel(ids_ref, word_ref, pos_ref, gamma_ref, beta_ref,
                              out_ref):
    # Shapes seen by the kernel (batch dim squeezed away by the BlockSpec):
    #   ids_ref  : (TS, 1)  int32
    #   word_ref : (V, D)   f32   (resident, constant index_map)
    #   pos_ref  : (TS, D)  f32   (rows j*TS .. j*TS+TS of the pos table)
    #   gamma/beta: (1, D)  f32   (resident)
    #   out_ref  : (TS, D)  f32
    TS, D = out_ref.shape
    V = word_ref.shape[0]

    # ---- word embedding lookup: one-hot @ table on the MXU ----
    ids = ids_ref[...]                                            # (TS, 1)
    vocab_iota = lax.broadcasted_iota(jnp.int32, (TS, V), 1)      # (TS, V)
    onehot = (ids == vocab_iota).astype(word_ref.dtype)           # exact 0/1
    word_emb = jnp.dot(onehot, word_ref[...],
                       preferred_element_type=jnp.float32)        # (TS, D)

    # ---- position embedding: direct slice delivered by the BlockSpec ----
    emb = word_emb + pos_ref[...]                                 # (TS, D)

    # ---- LayerNorm over d_model, eps = 1e-12 (f32 math) ----
    mean = jnp.mean(emb, axis=-1, keepdims=True)
    centered = emb - mean
    var = jnp.mean(centered * centered, axis=-1, keepdims=True)
    normed = centered * lax.rsqrt(var + 1e-12)

    # dropout == identity in eval mode
    out_ref[...] = normed * gamma_ref[...] + beta_ref[...]


def _pick_seq_tile(S):
    # Largest MXU/vreg friendly tile that divides S (multiple of 8 sublanes);
    # falls back to full S for odd lengths (full-dim blocks are always legal).
    for t in (512, 256, 128, 64, 32, 16, 8):
        if S % t == 0:
            return t
    return S


def decoder_embeddings(x, word_table, pos_table, gamma, beta, *, seq_tile=None):
    B, S = x.shape
    V, D = word_table.shape
    P = pos_table.shape[0]
    assert P >= S, "sequence length exceeds max_position"

    TS = seq_tile if seq_tile is not None else _pick_seq_tile(S)
    assert S % TS == 0

    # Pre-shape ids to a column layout so the kernel does no relayout.
    ids3 = x.astype(jnp.int32).reshape(B, S, 1)

    grid = (B, S // TS)
    return pl.pallas_call(
        decoder_embeddings_kernel,
        out_shape=jax.ShapeDtypeStruct((B, S, D), jnp.float32),
        grid=grid,
        in_specs=[
            # ids tile for (batch b, seq tile j); batch dim squeezed.
            pl.BlockSpec((None, TS, 1), lambda b, j: (b, j, 0)),
            # word table: whole table, constant index_map -> DMA'd once.
            # NOTE: for large vocab, re-budget VMEM (v7x: 64 MiB physical /
            # 32 MiB default scoped) or move to an HBM row-gather (see TODO).
            pl.BlockSpec((V, D), lambda b, j: (0, 0)),
            # position rows for this sequence tile (position_ids == arange(S)).
            pl.BlockSpec((TS, D), lambda b, j: (j, 0)),
            # LayerNorm gamma / beta: constant index_map, loaded once.
            pl.BlockSpec((1, D), lambda b, j: (0, 0)),
            pl.BlockSpec((1, D), lambda b, j: (0, 0)),
        ],
        out_specs=pl.BlockSpec((None, TS, D), lambda b, j: (b, j, 0)),
        compiler_params=pltpu.CompilerParams(
            dimension_semantics=("parallel", "parallel")),
    )(ids3, word_table, pos_table, gamma.reshape(1, D), beta.reshape(1, D))


def reference(x, word_table, pos_table, gamma, beta):
    B, S = x.shape
    we = word_table[x]                                # (B, S, D)
    pe = pos_table[jnp.arange(S)][None, :, :]         # (1, S, D)
    emb = we + pe
    mean = emb.mean(-1, keepdims=True)
    var = ((emb - mean) ** 2).mean(-1, keepdims=True)
    return (emb - mean) / jnp.sqrt(var + 1e-12) * gamma + beta


if __name__ == "__main__":
    # Module hyperparameters (small, consistent with the forward pass)
    d_model = 128
    max_position = 16
    vocab_size = 32
    pad_token_id = 0
    B, S = 2, 8

    key = jax.random.PRNGKey(0)
    k_w, k_p, k_x = jax.random.split(key, 3)

    # Deterministic parameter init (nn.Embedding ~ N(0,1); padding row zeroed;
    # LayerNorm gamma=1, beta=0).
    word_table = jax.random.normal(k_w, (vocab_size, d_model), jnp.float32)
    word_table = word_table.at[pad_token_id].set(0.0)
    pos_table = jax.random.normal(k_p, (max_position, d_model), jnp.float32)
    gamma = jnp.ones((d_model,), jnp.float32)
    beta = jnp.zeros((d_model,), jnp.float32)

    x = jax.random.randint(k_x, (B, S), 0, vocab_size, dtype=jnp.int32)

    out = decoder_embeddings(x, word_table, pos_table, gamma, beta)
    out = jax.block_until_ready(out)

    ref = reference(x, word_table, pos_table, gamma, beta)
    assert out.shape == (B, S, d_model)
    assert jnp.allclose(out, ref, atol=1e-4, rtol=1e-4)

    print("KERNEL_OK")
</pallas_src>

<mosaic_0001>
module attributes {stable_mosaic.version = 11 : i64} {
  func.func @decoder_embeddings_kernel(%arg0: i32, %arg1: i32, %arg2: memref<1x8x1xi32, #tpu.memory_space<vmem>>, %arg3: memref<32x128xf32, #tpu.memory_space<vmem>>, %arg4: memref<8x128xf32, #tpu.memory_space<vmem>>, %arg5: memref<1x128xf32, #tpu.memory_space<vmem>>, %arg6: memref<1x128xf32, #tpu.memory_space<vmem>>, %arg7: memref<1x8x128xf32, #tpu.memory_space<vmem>>) attributes {dimension_semantics = [#tpu.dimension_semantics<parallel>, #tpu.dimension_semantics<parallel>], iteration_bounds = array<i64: 2, 1>, scalar_prefetch = 0 : i64, scratch_operands = 0 : i64, tpu.core_type = #tpu.core_type<tc>, window_params = [{transform_indices = @transform_0, window_bounds = array<i64: 1, 8, 1>}, {pipeline_mode = #tpu.pipeline_mode<synchronous>, transform_indices = @transform_1, window_bounds = array<i64: 32, 128>}, {transform_indices = @transform_2, window_bounds = array<i64: 8, 128>}, {pipeline_mode = #tpu.pipeline_mode<synchronous>, transform_indices = @transform_3, window_bounds = array<i64: 1, 128>}, {pipeline_mode = #tpu.pipeline_mode<synchronous>, transform_indices = @transform_4, window_bounds = array<i64: 1, 128>}, {transform_indices = @transform_5, window_bounds = array<i64: 1, 8, 128>}]} {
    %c0 = arith.constant 0 : index
    %c0_0 = arith.constant 0 : index
    %c0_1 = arith.constant 0 : index
    %0 = vector.load %arg2[%c0, %c0_0, %c0_1] : memref<1x8x1xi32, #tpu.memory_space<vmem>>, vector<1x8x1xi32>
    %1 = vector.shape_cast %0 : vector<1x8x1xi32> to vector<8x1xi32>
    %2 = tpu.iota {dimensions = array<i32: 1>} : vector<8x32xi32>
    %3 = vector.broadcast %1 : vector<8x1xi32> to vector<8x32xi32>
    %4 = arith.cmpi eq, %3, %2 : vector<8x32xi32>
    %5 = arith.extui %4 : vector<8x32xi1> to vector<8x32xi32>
    %6 = arith.sitofp %5 : vector<8x32xi32> to vector<8x32xf32>
    %c0_2 = arith.constant 0 : index
    %c0_3 = arith.constant 0 : index
    %7 = vector.load %arg3[%c0_2, %c0_3] : memref<32x128xf32, #tpu.memory_space<vmem>>, vector<32x128xf32>
    %cst = arith.constant dense<0.000000e+00> : vector<8x128xf32>
    %8 = tpu.matmul %6, %7, %cst {dimension_numbers = #tpu.dot_dimension_numbers<[1], [0], [0], [1], [0, 0, 1, 1], [], []>} : vector<8x32xf32>, vector<32x128xf32>, vector<8x128xf32> -> vector<8x128xf32>
    %c0_4 = arith.constant 0 : index
    %c0_5 = arith.constant 0 : index
    %9 = vector.load %arg4[%c0_4, %c0_5] : memref<8x128xf32, #tpu.memory_space<vmem>>, vector<8x128xf32>
    %10 = arith.addf %8, %9 : vector<8x128xf32>
    %cst_6 = arith.constant dense<0.000000e+00> : vector<8xf32>
    %11 = vector.multi_reduction <add>, %10, %cst_6 [1] : vector<8x128xf32> to vector<8xf32>
    %12 = vector.shape_cast %11 : vector<8xf32> to vector<8x1xf32>
    %cst_7 = arith.constant 1.280000e+02 : f32
    %13 = vector.broadcast %cst_7 : f32 to vector<8x1xf32>
    %14 = arith.divf %12, %13 : vector<8x1xf32>
    %15 = vector.broadcast %14 : vector<8x1xf32> to vector<8x128xf32>
    %16 = arith.subf %10, %15 : vector<8x128xf32>
    %17 = arith.mulf %16, %16 : vector<8x128xf32>
    %cst_8 = arith.constant dense<0.000000e+00> : vector<8xf32>
    %18 = vector.multi_reduction <add>, %17, %cst_8 [1] : vector<8x128xf32> to vector<8xf32>
    %19 = vector.shape_cast %18 : vector<8xf32> to vector<8x1xf32>
    %cst_9 = arith.constant 1.280000e+02 : f32
    %20 = vector.broadcast %cst_9 : f32 to vector<8x1xf32>
    %21 = arith.divf %19, %20 : vector<8x1xf32>
    %cst_10 = arith.constant 9.99999996E-13 : f32
    %22 = vector.broadcast %cst_10 : f32 to vector<8x1xf32>
    %23 = arith.addf %21, %22 : vector<8x1xf32>
    %24 = math.rsqrt %23 : vector<8x1xf32>
    %25 = vector.broadcast %24 : vector<8x1xf32> to vector<8x128xf32>
    %26 = arith.mulf %16, %25 : vector<8x128xf32>
    %c0_11 = arith.constant 0 : index
    %c0_12 = arith.constant 0 : index
    %27 = vector.load %arg5[%c0_11, %c0_12] : memref<1x128xf32, #tpu.memory_space<vmem>>, vector<1x128xf32>
    %28 = vector.broadcast %27 : vector<1x128xf32> to vector<8x128xf32>
    %29 = arith.mulf %26, %28 : vector<8x128xf32>
    %c0_13 = arith.constant 0 : index
    %c0_14 = arith.constant 0 : index
    %30 = vector.load %arg6[%c0_13, %c0_14] : memref<1x128xf32, #tpu.memory_space<vmem>>, vector<1x128xf32>
    %31 = vector.broadcast %30 : vector<1x128xf32> to vector<8x128xf32>
    %32 = arith.addf %29, %31 : vector<8x128xf32>
    %c0_15 = arith.constant 0 : index
    %c0_16 = arith.constant 0 : index
    %c0_17 = arith.constant 0 : index
    %33 = vector.load %arg7[%c0_15, %c0_16, %c0_17] : memref<1x8x128xf32, #tpu.memory_space<vmem>>, vector<1x8x128xf32>
    %34 = vector.shape_cast %33 : vector<1x8x128xf32> to vector<8x128xf32>
    %35 = vector.shape_cast %32 : vector<8x128xf32> to vector<1x8x128xf32>
    tpu.vector_store %arg7[%c0_15, %c0_16, %c0_17], %35 {strides = array<i32>} : memref<1x8x128xf32, #tpu.memory_space<vmem>>, vector<1x8x128xf32>,
    return
  }
  func.func @transform_0(%arg0: i32, %arg1: i32) -> (i32, i32, i32) {
    %c0_i32 = arith.constant 0 : i32
    %c0_i32_0 = arith.constant 0 : i32
    return %arg0, %arg1, %c0_i32 : i32, i32, i32
  }
  func.func @transform_1(%arg0: i32, %arg1: i32) -> (i32, i32) {
    %c0_i32 = arith.constant 0 : i32
    %c0_i32_0 = arith.constant 0 : i32
    %c0_i32_1 = arith.constant 0 : i32
    return %c0_i32, %c0_i32_0 : i32, i32
  }
  func.func @transform_2(%arg0: i32, %arg1: i32) -> (i32, i32) {
    %c0_i32 = arith.constant 0 : i32
    %c0_i32_0 = arith.constant 0 : i32
    return %arg1, %c0_i32 : i32, i32
  }
  func.func @transform_3(%arg0: i32, %arg1: i32) -> (i32, i32) {
    %c0_i32 = arith.constant 0 : i32
    %c0_i32_0 = arith.constant 0 : i32
    %c0_i32_1 = arith.constant 0 : i32
    return %c0_i32, %c0_i32_0 : i32, i32
  }
  func.func @transform_4(%arg0: i32, %arg1: i32) -> (i32, i32) {
    %c0_i32 = arith.constant 0 : i32
    %c0_i32_0 = arith.constant 0 : i32
    %c0_i32_1 = arith.constant 0 : i32
    return %c0_i32, %c0_i32_0 : i32, i32
  }
  func.func @transform_5(%arg0: i32, %arg1: i32) -> (i32, i32, i32) {
    %c0_i32 = arith.constant 0 : i32
    %c0_i32_0 = arith.constant 0 : i32
    return %arg0, %arg1, %c0_i32 : i32, i32, i32
  }
}

</mosaic_0001>

<bundles_post_ra>
// kernel: tpu_custom_call.1
= control target key start
LH: loop header
LB: loop body
LE: loop exit
PB: predicated region body
PF: predicated region fallthrough
CT: control target
= control target key end

     0   :  { %10 = vsyncpa [#allocation3], 0  ;;  %s889_s0 = inlined_call_operand.vmem [shape: s32[2,8,1], index: 0, kind: input, shape index: {}]   ;;  %s890_s1 = inlined_call_operand.hbm [shape: f32[32,128], index: 1, kind: input, shape index: {}]   ;;  %s891_s2 = inlined_call_operand.vmem [shape: f32[16,128], index: 2, kind: input, shape index: {}]   ;;  %s892_s3 = inlined_call_operand.vmem [shape: f32[1,128], index: 3, kind: input, shape index: {}]   ;;  %s893_s4 = inlined_call_operand.vmem [shape: f32[1,128], index: 4, kind: input, shape index: {}]   ;;  %s894_s5 = inlined_call_operand.hbm [shape: f32[2,8,128], index: 5, kind: output, shape index: {}]  }
   0x1   :  { %11 = vsyncpa [#allocation4], 0 }
   0x2   :  { %13 = vsyncpa [#allocation4 + $0x1], 0  ;;  %s760_s18 = smov 0   ;;  %s762_s19 = smov 0  }
   0x3   :  { %s764_s20 = smov 0   ;;  %s766_s21 = smov 0  }
   0x4   :  { %s768_s22 = smov 0   ;;  %s770_s23 = smov 0  }
   0x5 LB: > { %s507_s24 = sadd.s32 4294967295, %s721_s23   ;;  %s508_s25 = sadd.s32 4294967294, %s721_s23   ;;  %s721_s23 = sphi %s770_s23, %s19_s23   ;;  %s717_s22 = sphi %s768_s22, %s903_s22   ;;  %s713_s21 = sphi %s766_s21, %s902_s21   ;;  %s709_s20 = sphi %s764_s20, %s901_s20   ;;  %s705_s19 = sphi %s762_s19, %s900_s19   ;;  %s701_s18 = sphi %s760_s18, %s899_s18  }
   0x6   : > { %s31_s26 = sadd.s32 1, %s717_s22  ;;  %s157_s27 = sadd.s32 1, %s709_s20 }
   0x7   : > { %p33_p0 = scmp.ge.s32.totalorder %s31_s26, 2  ;;  %p167_p1 = scmp.ne.s32.totalorder %s709_s20, %s705_s19 }
   0x8   : > { %p168_p2 = scmp.eq.s32.totalorder %s507_s24, 1  ;;  %p173_p3 = scmp.ne.s32.totalorder %s705_s19, %s701_s18 }
   0x9   : > { %s905_s26 = smov (%p33_p0, %s31_s26), 0  ;;  %p174_p5 = scmp.eq.s32.totalorder %s508_s25, 1 }
   0xa   : > { %p800_p4 = por %p168_p2, %p167_p1  ;;  %s152_s29 = ssub.s32 %s717_s22, %s905_s26 }
   0xb   : > { %p509_p6 = scmp.ge.s32.totalorder %s721_s23, 1  ;;  %p155_p7 = scmp.eq.s32.totalorder %s152_s29, 0 }
   0xc   : > { %p807_p8 = por %p174_p5, %p173_p3  ;;  %p181_p9 = scmp.lt.s32.totalorder %s721_s23, 3 }
   0xd   : > { %s813_s6 = scalar_select %p155_p7, %s709_s20, %s157_s27  }
   0xe   : > { %p815_p10 = pnand %p509_p6, %p181_p9  ;;  %p819_p11 = scmp.eq.s32.totalorder %s507_s24, 0 }
   0xf   : > { %s723_s9 = smov [#allocation2]  }
  0x10   : > { %p547_p12 = pneg %p815_p10  ;;  %s193_s10 = sshll.u32 %s723_s9, 4  ;;  %s194_s10 = int_to_ptr.vmem [resolvable:$true] %s193_s10 }
  0x11   : > { %s626_s11 = scalar_lea.vmem %s194_s10, 512  ;;  %p634_p5 = scmp.lt.s32.totalorder %s194_s10, %s194_s10 }
  0x12   : > { %p548_p13 = pnand %p819_p11, %p547_p12  ;;  %p627_p1 = scmp.ne.s32.totalorder %s194_s10, %s626_s11 }
  0x13   : > { %p635_p6 = scmp.lt.s32.totalorder %s626_s11, %s626_s11 }
  0x14   : > { %p617_p0 = pneg %p548_p13 }
  0x15   : > { %p636_p7 = por %p635_p6, %p634_p5 }
  0x16   : > { %p629_p2 = pnand %p627_p1, %p617_p0 }
  0x18   : > { %p630_p3 = pneg %p629_p2 }
  0x1a   : > { %p637_p9 = pnand %p636_p7, %p630_p3 }
  0x1c   : > { %640 = shalt.err (!%p637_p9)
}
  0x1d   : > { %s724_s12 = smov 128   ;;  %s725_s13 = smov 8  }
  0x1e   : > { %550 = dma.hbm_to_vmem [thread:$0]  (!%p548_p13), %s890_s1, 512, %s194_s10, [#allocation3], %s724_s12, %s724_s12, %s725_s13  }
  0x1f   : > { %232 = sbr.rel (%p815_p10) target bundleno = 684 (0x2ac), region = 40 }
  0x24   : > { %692 = dma.done.wait (%p819_p11), [#allocation3], 512  }
  0x25   : > { %694 = vsyncadd (%p819_p11), [#allocation3], 4294966784  ;;  %p266_p12 = scmp.lt.s32.totalorder %s713_s21, 1  ;;  %v726_v0 = vmov 0   ;;  %v727_v1 = vmov 0.0   ;;  %vm728_vm0 = vmmov 0   ;;  %v278_v7 = vlaneseq }
  0x26   : > { %612 = vset.pattern.permute.xlu0 %v726_v0  ;;  %530 = vmatprep.subr.mxu0 %v727_v1  ;;  %v289_v3 = vld [vmem:[#allocation2 + $0x18] sm:$0xff]  ;;  %v288_v4 = vld [vmem:[#allocation2 + $0x10] sm:$0xff]  ;;  %v287_v5 = vld [vmem:[#allocation2 + $0x8] sm:$0xff]  ;;  %vm291_vm1 = vcmask 261120   ;;  %s263_s8 = sand.u32 1, %s705_s19   ;;  %s522_s14 = sshll.u32 %s713_s21, 7 }
  0x27   : > { %s267_s16 = scalar_select %p266_p12, %s713_s21, 1  ;;  %538 = vmatprep.mubr.msk.f32.mxu0 %vm728_vm0, %v727_v1  ;;  %531 = vmatpush3.msra.mxu0 %v289_v3  ;;  %v286_v6 = vld [vmem:[#allocation2] sm:$0xff]  ;;  %v279_v8 = vand.u32 127, %v278_v7 }
  0x28   : > { %532 = vmatprep.subr.mxu0 %v727_v1  ;;  %v290_v11 = vld [vmem:[%s891_s2] sm:$0xff]  ;;  %s515_s9 = sshll.u32 %s263_s8, 3  ;;  %s407_s25 = scalar_lea.hbm %s894_s5, %s522_s14 }
  0x29   : > { %s516_s17 = sshll.u32 %s267_s16, 3  ;;  %533 = vmatpush3.msra.mxu0 %v288_v4  ;;  %v519_v23 = vld [vmem:[%s892_s3] ss:$0 sm:$0xff]  ;;  %s265_s15 = scalar_lea.vmem [#allocation5], %s515_s9 }
  0x2a   : > { %s272_s27 = scalar_lea.vmem %s889_s0, %s516_s17  ;;  %534 = vmatprep.subr.mxu0 %v727_v1  ;;  %v520_v25 = vld [vmem:[%s893_s4] ss:$0 sm:$0xff]  ;;  %s409_s16 = sshll.u32 %s265_s15, 4  ;;  %s410_s16 = int_to_ptr.vmem [resolvable:$true] %s409_s16 }
  0x2b   : > { %v277_v2 = vld [vmem:[%s272_s27] sm:$0xff]  ;;  %535 = vmatpush3.msra.mxu0 %v287_v5  ;;  %s395_s27 = scalar_lea.sflag [#allocation4], %s263_s8  ;;  %s641_s29 = scalar_lea.vmem %s410_s16, 128 }
  0x2c   : > { %281 = vperm.xlu0 %612, %v277_v2   ;;  %536 = vmatprep.subr.mxu0 %v727_v1  ;;  %p642_p10 = scmp.ne.s32.totalorder %s410_s16, %s641_s29  ;;  %s729_s7 = smov [#allocation5]  }
  0x2d   : > { %537 = vmatpush3.msra.mxu0 %v286_v6  ;;  %s645_s10 = sshll.u32 %s729_s7, 4  ;;  %s646_s10 = int_to_ptr.vmem [resolvable:$false] %s645_s10 }
  0x2e   : > { %p643_p11 = pnand %p642_p10, %p800_p4  ;;  %s647_s21 = scalar_lea.vmem %s646_s10, 256 }
  0x2f   : > { %p648_p0 = scmp.lt.s32.totalorder %s410_s16, %s646_s10  ;;  %p649_p1 = scmp.lt.s32.totalorder %s647_s21, %s641_s29 }
  0x30   : > { %p644_p13 = pneg %p643_p11 }
  0x31   : > { %p650_p2 = por %p649_p1, %p648_p0 }
  0x33   : > { %p651_p3 = pnand %p650_p2, %p644_p13 }
  0xa7   : > { %v282_v9 = vpop.permute.xlu0 %281 }
  0xa8   : > { %vm283_vm2 = vcmp.eq.s32.totalorder %v282_v9, %v279_v8 }
  0xa9   : > { %v517_v10 = vsel %vm283_vm2, 1.0, %v727_v1 }
  0xaa   : > { %539 = vmatmul.mubr.msk.f32.vlgmr.msra.gmra.mxu0 %vm291_vm1, %v517_v10 }
 0x16a   : > { %v361_v12 = vpop.f32.mrf.mxu0 }
 0x16b   : > { %v362_v13 = vadd.f32 %v361_v12, %v290_v11 }
 0x16c   : > { %v540_v14 = vpop.f32.mrf.mxu0 }
 0x16d   : > { %365 = vadd.xlane.f32.xlu0 %v362_v13 }
 0x1f6   : > { %v366_v15 = vpop.xlane.xlu0 %365 }
 0x1f7   : > { %v368_v16 = vmul.f32 0.0078125, %v366_v15 }
 0x1f9   : > { %v369_v17 = vsub.f32 %v362_v13, %v368_v16 }
 0x1fb   : > { %v370_v18 = vmul.f32 %v369_v17, %v369_v17 }
 0x1fd   : > { %371 = vadd.xlane.f32.xlu1 %v370_v18 }
 0x286   : > { %v372_v19 = vpop.xlane.xlu1 %371 }
 0x287   : > { %v373_v20 = vmul.f32 0.0078125, %v372_v19 }
 0x289   : > { %v374_v21 = vadd.f32 1e-12, %v373_v20 }
 0x28b   : > { %613 = vrsqrt.f32 %v374_v21 }
 0x298   : > { %v614_v22 = vpop.eup %613 }
 0x299   : > { %v376_v24 = vmul.f32 %v614_v22, %v369_v17 }
 0x29b   : > { %v384_v26 = vmul.f32 %v519_v23, %v376_v24 }
 0x29d   : > { %v392_v27 = vadd.f32 %v520_v25, %v384_v26 }
 0x29f   : > { %393 = vst [vmem:[%s265_s15] sm:$0xff] %v392_v27 }
 0x2a0   : > { %654 = shalt.err (!%p651_p3)
}
 0x2a1   : > { %s655_s9 = scalar_lea.hbm %s407_s25, 128  ;;  %s659_s12 = scalar_lea.hbm %s894_s5, 256 }
 0x2a2   : > { %p656_p5 = scmp.ne.s32.totalorder %s407_s25, %s655_s9  ;;  %p660_p9 = scmp.lt.s32.totalorder %s407_s25, %s894_s5 }
 0x2a3   : > { %p661_p12 = scmp.lt.s32.totalorder %s659_s12, %s655_s9 }
 0x2a4   : > { %p657_p6 = pnand %p656_p5, %p800_p4 }
 0x2a5   : > { %p662_p10 = por %p661_p12, %p660_p9 }
 0x2a6   : > { %p658_p7 = pneg %p657_p6 }
 0x2a8   : > { %p663_p11 = pnand %p662_p10, %p658_p7 }
 0x2aa   : > { %666 = shalt.err (!%p663_p11)
}
 0x2ab   : > { %545 = dma.vmem_to_hbm [thread:$0]  (%p800_p4), %s410_s16, 128, %s407_s25, %s395_s27  }
 0x2ac PF: > { %p557_p13 = scmp.ge.s32.totalorder %s721_s23, 2  ;;  %s421_s15 = sand.u32 1, %s701_s18  }
 0x2ad   : > { %s422_s17 = scalar_lea.sflag [#allocation4], %s421_s15 }
 0x2ae   : > { %p552_p0 = pnand %p557_p13, %p807_p8 }
 0x2b0   : > { %p553_p1 = pneg %p552_p0 }
 0x2b2   : > { %696 = dma.done.wait (%p553_p1), %s422_s17, 128  }
 0x2b3   : > { %698 = vsyncadd (%p553_p1), %s422_s17, 4294967168  ;;  %s19_s23 = sadd.s32 1, %s721_s23   ;;  %s899_s18 = smov %s705_s19 }
 0x2b4   : > { %p16_p2 = scmp.ge.s32.totalorder %s19_s23, 4   ;;  %s900_s19 = smov %s709_s20 }
 0x2b5   : > { %s901_s20 = smov %s813_s6  ;;  %s902_s21 = smov %s717_s22 }
 0x2b6   : > { %s903_s22 = smov %s905_s26  ;;  %18 = sbr.rel (!%p16_p2) target bundleno = 5 (0x5), region = 83 }
 0x2bb   :  { %427 = vsyncpa [#allocation3], 1 }
 0x2bc   :  { %429 = vsyncpa [#allocation3 + $0x1], 1 }
 0x2bd   :  { %430 = vsyncpa [#allocation4], 1 }
 0x2be   :  { %432 = vsyncpa [#allocation4 + $0x1], 1 }

</bundles_post_ra>
